<compile_context>
chip_gen: v7x
topology: tpu7x:2x2x1
jax: 0.10.0
libtpu: 0.0.40
codegen_flags: <defaults>
</compile_context>

<pallas_src>
import functools
import math

import jax
import jax.numpy as jnp
from jax.experimental import pallas as pl
from jax.experimental.pallas import tpu as pltpu


def _round_up(n, m):
    return ((n + m - 1) // m) * m


def prober_kernel(x_ref, w1_ref, b1_ref, w2_ref, b2_ref, w3_ref, b3_ref, o_ref):
    """Fused 3-layer MLP on one [tb, 256] batch tile.

    x arrives in its HBM dtype (f32) and is cast to the matmul dtype (the
    weights' dtype) on the VPU inside the kernel -- no separate bf16 copy of x
    in HBM.  Accumulation, bias adds and ReLU run in f32.
    """
    xb = x_ref[...].astype(w1_ref.dtype)                            # [tb, 256]

    h1 = jnp.dot(xb, w1_ref[...], preferred_element_type=jnp.float32)
    h1 = jnp.maximum(h1 + b1_ref[...], 0.0)                         # ReLU, f32

    h2 = jnp.dot(h1.astype(w2_ref.dtype), w2_ref[...],
                 preferred_element_type=jnp.float32)
    h2 = jnp.maximum(h2 + b2_ref[...], 0.0)                         # ReLU, f32

    out = jnp.dot(h2.astype(w3_ref.dtype), w3_ref[...],
                  preferred_element_type=jnp.float32)
    o_ref[...] = (out + b3_ref[...]).astype(o_ref.dtype)            # Identity


def _choose_tile(batch, tile_b):
    """Batch tile: full-extent block for small B (always layout-legal);
    otherwise a multiple of 128 capped at tile_b and sized so the grid has
    >=2 steps (keeps both v7x TensorCores busy via the 'parallel' axis)."""
    if batch <= 256:
        return batch
    half = _round_up(-(-batch // 2), 128)
    return max(128, min(_round_up(tile_b, 128), half))


@functools.partial(jax.jit, static_argnames=("tile_b", "use_bf16"))
def prober_forward(x, params, *, tile_b=4096, use_bf16=True):
    """x: [B, input_dim]; params: dict from init_params. Returns [B, 2] f32."""
    w1, b1 = params["w1"], params["b1"]
    w2, b2 = params["w2"], params["b2"]
    w3, b3 = params["w3"], params["b3"]

    B, d_in = x.shape
    h1_dim, h2_dim, d_out = w1.shape[1], w2.shape[1], w3.shape[1]

    # Matmul dtype: bf16 (MXU-native fast path, half the weight bytes) or f32
    # (exact PyTorch x.float() semantics).  Only the tiny weights are cast
    # here; x is NOT copied/cast in HBM -- the kernel casts each tile in VMEM.
    mm_dtype = jnp.bfloat16 if use_bf16 else jnp.float32
    w1 = w1.astype(mm_dtype)
    w2 = w2.astype(mm_dtype)
    w3 = w3.astype(mm_dtype)
    b1 = b1.astype(jnp.float32)
    b2 = b2.astype(jnp.float32)
    b3 = b3.astype(jnp.float32)
    w_bytes = w1.dtype.itemsize

    tb = _choose_tile(B, tile_b)
    grid = (pl.cdiv(B, tb),)          # partial last block handled by Pallas

    # VMEM budget for this tile size: x double-buffered, lane-padded (tb,128)
    # out double-buffered, resident weights, f32 intermediates, plus slack.
    n_weights = d_in * h1_dim + h1_dim * h2_dim + h2_dim * d_out
    vmem_need = (2 * tb * d_in * x.dtype.itemsize
                 + 2 * tb * 128 * 4
                 + n_weights * w_bytes
                 + tb * (d_in + h1_dim + h2_dim) * 4)
    vmem_limit = int(min(max(int(vmem_need * 1.25), 32 * 1024 * 1024),
                         96 * 1024 * 1024))

    flops = 2 * B * n_weights
    bytes_accessed = (B * d_in * x.dtype.itemsize        # read x (no copy pass)
                      + B * d_out * 4                     # write out (f32)
                      + n_weights * w_bytes               # weights (bf16/f32)
                      + (h1_dim + h2_dim + d_out) * 4)    # biases (f32)
    cost = pl.CostEstimate(flops=flops, transcendentals=0,
                           bytes_accessed=bytes_accessed)

    return pl.pallas_call(
        prober_kernel,
        out_shape=jax.ShapeDtypeStruct((B, d_out), jnp.float32),
        grid_spec=pltpu.PrefetchScalarGridSpec(
            num_scalar_prefetch=0,
            grid=grid,
            in_specs=[
                # x streams one batch tile per grid step (double-buffered DMA).
                # (v5e: if the trace still shows exposed input DMA at this tb,
                # add pipeline_mode=pl.Buffered(3) to this spec.)
                pl.BlockSpec((tb, d_in), lambda i: (i, 0)),
                # Weights / biases: same block every step -> stay resident.
                pl.BlockSpec((d_in, h1_dim), lambda i: (0, 0)),
                pl.BlockSpec((1, h1_dim), lambda i: (0, 0)),
                pl.BlockSpec((h1_dim, h2_dim), lambda i: (0, 0)),
                pl.BlockSpec((1, h2_dim), lambda i: (0, 0)),
                pl.BlockSpec((h2_dim, d_out), lambda i: (0, 0)),
                pl.BlockSpec((1, d_out), lambda i: (0, 0)),
            ],
            out_specs=pl.BlockSpec((tb, d_out), lambda i: (i, 0)),
        ),
        compiler_params=pltpu.CompilerParams(
            dimension_semantics=("parallel",),    # megacore-shard batch (v7x)
            vmem_limit_bytes=vmem_limit,
        ),
        cost_estimate=cost,
    )(x, w1, b1, w2, b2, w3, b3)


def init_params(key, input_dim=256, hidden_dims=(128, 64), out_dim=2):
    """nn.Linear default init: U[-1/sqrt(fan_in), 1/sqrt(fan_in)].

    Weights stored [in_features, out_features] (transpose of PyTorch's
    [out, in]) so the kernel computes x @ W + b; biases kept [1, out] for a
    clean 2-D broadcast on TPU.
    """
    dims = [input_dim] + list(hidden_dims) + [out_dim]
    params = {}
    for i in range(len(dims) - 1):
        fan_in, fan_out = dims[i], dims[i + 1]
        key, kw, kb = jax.random.split(key, 3)
        bound = 1.0 / math.sqrt(fan_in)
        params[f"w{i+1}"] = jax.random.uniform(
            kw, (fan_in, fan_out), jnp.float32, -bound, bound)
        params[f"b{i+1}"] = jax.random.uniform(
            kb, (1, fan_out), jnp.float32, -bound, bound)
    return params


def prober_reference(x, params, *, use_bf16=False):
    """Pure-JAX reference mirroring the kernel's dtype choices."""
    mm_dtype = jnp.bfloat16 if use_bf16 else jnp.float32
    w1 = params["w1"].astype(mm_dtype)
    w2 = params["w2"].astype(mm_dtype)
    w3 = params["w3"].astype(mm_dtype)
    h = x.astype(mm_dtype)
    h = jnp.maximum(jnp.dot(h, w1, preferred_element_type=jnp.float32)
                    + params["b1"], 0.0)
    h = jnp.maximum(jnp.dot(h.astype(mm_dtype), w2,
                            preferred_element_type=jnp.float32)
                    + params["b2"], 0.0)
    return (jnp.dot(h.astype(mm_dtype), w3, preferred_element_type=jnp.float32)
            + params["b3"])


# TODO(synk): CrossEntropyLoss / Adam / train_model / evaluate / load_pretrained
# are host-side training utilities, not part of the forward pass; not translated.

if __name__ == "__main__":
    key = jax.random.PRNGKey(0)
    k_params, k_x1, k_x2 = jax.random.split(key, 3)

    input_dim, hidden_dims, out_dim = 256, (128, 64), 2
    params = init_params(k_params, input_dim, hidden_dims, out_dim)

    # Small batch on the exact-f32 path (PyTorch x.float() semantics);
    # single full-extent block, grid of 1.
    x_small = jax.random.normal(k_x1, (8, input_dim), jnp.float32)
    out_f32 = jax.block_until_ready(
        prober_forward(x_small, params, use_bf16=False))
    ref_f32 = prober_reference(x_small, params, use_bf16=False)
    assert out_f32.shape == (8, out_dim)
    assert jnp.allclose(out_f32, ref_f32, atol=1e-4, rtol=1e-4), \
        "f32 path mismatch vs reference"

    # Ragged batch on the default bf16 MXU fast path: B=300 -> tb=256, grid=2
    # with a masked partial last block (no wrapper-side pad / slice passes).
    x_big = jax.random.normal(k_x2, (300, input_dim), jnp.float32)
    out_bf16 = jax.block_until_ready(prober_forward(x_big, params))
    ref_bf16 = prober_reference(x_big, params, use_bf16=True)
    ref_f32b = prober_reference(x_big, params, use_bf16=False)
    assert out_bf16.shape == (300, out_dim)
    assert bool(jnp.all(jnp.isfinite(out_bf16))), \
        "NaN/Inf leaked from the partial last block"
    assert jnp.allclose(out_bf16, ref_bf16, atol=2e-2, rtol=2e-2), \
        "bf16 path mismatch vs bf16 reference"
    assert jnp.allclose(out_bf16, ref_f32b, atol=1e-1, rtol=1e-1), \
        "bf16 path drifted too far from f32 semantics"

    print("KERNEL_OK")
</pallas_src>

<mosaic_0001>
module attributes {stable_mosaic.version = 11 : i64} {
  func.func @prober_kernel(%arg0: i32, %arg1: memref<8x256xf32, #tpu.memory_space<vmem>>, %arg2: memref<256x128xf32, #tpu.memory_space<vmem>>, %arg3: memref<1x128xf32, #tpu.memory_space<vmem>>, %arg4: memref<128x64xf32, #tpu.memory_space<vmem>>, %arg5: memref<1x64xf32, #tpu.memory_space<vmem>>, %arg6: memref<64x2xf32, #tpu.memory_space<vmem>>, %arg7: memref<1x2xf32, #tpu.memory_space<vmem>>, %arg8: memref<8x2xf32, #tpu.memory_space<vmem>>) attributes {dimension_semantics = [#tpu.dimension_semantics<parallel>], iteration_bounds = array<i64: 1>, scalar_prefetch = 0 : i64, scratch_operands = 0 : i64, tpu.core_type = #tpu.core_type<tc>, window_params = [{transform_indices = @transform_0, window_bounds = array<i64: 8, 256>}, {pipeline_mode = #tpu.pipeline_mode<synchronous>, transform_indices = @transform_1, window_bounds = array<i64: 256, 128>}, {pipeline_mode = #tpu.pipeline_mode<synchronous>, transform_indices = @transform_2, window_bounds = array<i64: 1, 128>}, {pipeline_mode = #tpu.pipeline_mode<synchronous>, transform_indices = @transform_3, window_bounds = array<i64: 128, 64>}, {pipeline_mode = #tpu.pipeline_mode<synchronous>, transform_indices = @transform_4, window_bounds = array<i64: 1, 64>}, {pipeline_mode = #tpu.pipeline_mode<synchronous>, transform_indices = @transform_5, window_bounds = array<i64: 64, 2>}, {pipeline_mode = #tpu.pipeline_mode<synchronous>, transform_indices = @transform_6, window_bounds = array<i64: 1, 2>}, {transform_indices = @transform_7, window_bounds = array<i64: 8, 2>}]} {
    %c0 = arith.constant 0 : index
    %c0_0 = arith.constant 0 : index
    %0 = vector.load %arg1[%c0, %c0_0] : memref<8x256xf32, #tpu.memory_space<vmem>>, vector<8x256xf32>
    %c0_1 = arith.constant 0 : index
    %c0_2 = arith.constant 0 : index
    %1 = vector.load %arg2[%c0_1, %c0_2] : memref<256x128xf32, #tpu.memory_space<vmem>>, vector<256x128xf32>
    %cst = arith.constant dense<0.000000e+00> : vector<8x128xf32>
    %2 = tpu.matmul %0, %1, %cst {dimension_numbers = #tpu.dot_dimension_numbers<[1], [0], [0], [1], [0, 0, 1, 1], [], []>} : vector<8x256xf32>, vector<256x128xf32>, vector<8x128xf32> -> vector<8x128xf32>
    %c0_3 = arith.constant 0 : index
    %c0_4 = arith.constant 0 : index
    %3 = vector.load %arg3[%c0_3, %c0_4] : memref<1x128xf32, #tpu.memory_space<vmem>>, vector<1x128xf32>
    %4 = vector.broadcast %3 : vector<1x128xf32> to vector<8x128xf32>
    %5 = arith.addf %2, %4 : vector<8x128xf32>
    %cst_5 = arith.constant 0.000000e+00 : f32
    %6 = vector.broadcast %cst_5 : f32 to vector<8x128xf32>
    %7 = arith.maximumf %5, %6 : vector<8x128xf32>
    %c0_6 = arith.constant 0 : index
    %c0_7 = arith.constant 0 : index
    %8 = vector.load %arg4[%c0_6, %c0_7] : memref<128x64xf32, #tpu.memory_space<vmem>>, vector<128x64xf32>
    %cst_8 = arith.constant dense<0.000000e+00> : vector<8x64xf32>
    %9 = tpu.matmul %7, %8, %cst_8 {dimension_numbers = #tpu.dot_dimension_numbers<[1], [0], [0], [1], [0, 0, 1, 1], [], []>} : vector<8x128xf32>, vector<128x64xf32>, vector<8x64xf32> -> vector<8x64xf32>
    %c0_9 = arith.constant 0 : index
    %c0_10 = arith.constant 0 : index
    %10 = vector.load %arg5[%c0_9, %c0_10] : memref<1x64xf32, #tpu.memory_space<vmem>>, vector<1x64xf32>
    %11 = vector.broadcast %10 : vector<1x64xf32> to vector<8x64xf32>
    %12 = arith.addf %9, %11 : vector<8x64xf32>
    %cst_11 = arith.constant 0.000000e+00 : f32
    %13 = vector.broadcast %cst_11 : f32 to vector<8x64xf32>
    %14 = arith.maximumf %12, %13 : vector<8x64xf32>
    %c0_12 = arith.constant 0 : index
    %c0_13 = arith.constant 0 : index
    %15 = vector.load %arg6[%c0_12, %c0_13] : memref<64x2xf32, #tpu.memory_space<vmem>>, vector<64x2xf32>
    %cst_14 = arith.constant dense<0.000000e+00> : vector<8x2xf32>
    %16 = tpu.matmul %14, %15, %cst_14 {dimension_numbers = #tpu.dot_dimension_numbers<[1], [0], [0], [1], [0, 0, 1, 1], [], []>} : vector<8x64xf32>, vector<64x2xf32>, vector<8x2xf32> -> vector<8x2xf32>
    %c0_15 = arith.constant 0 : index
    %c0_16 = arith.constant 0 : index
    %17 = vector.load %arg7[%c0_15, %c0_16] : memref<1x2xf32, #tpu.memory_space<vmem>>, vector<1x2xf32>
    %18 = vector.broadcast %17 : vector<1x2xf32> to vector<8x2xf32>
    %19 = arith.addf %16, %18 : vector<8x2xf32>
    %c0_17 = arith.constant 0 : index
    %c0_18 = arith.constant 0 : index
    %20 = vector.load %arg8[%c0_17, %c0_18] : memref<8x2xf32, #tpu.memory_space<vmem>>, vector<8x2xf32>
    tpu.vector_store %arg8[%c0_17, %c0_18], %19 {strides = array<i32>} : memref<8x2xf32, #tpu.memory_space<vmem>>, vector<8x2xf32>,
    return
  }
  func.func @transform_0(%arg0: i32) -> (i32, i32) {
    %c0_i32 = arith.constant 0 : i32
    %c0_i32_0 = arith.constant 0 : i32
    return %arg0, %c0_i32 : i32, i32
  }
  func.func @transform_1(%arg0: i32) -> (i32, i32) {
    %c0_i32 = arith.constant 0 : i32
    %c0_i32_0 = arith.constant 0 : i32
    %c0_i32_1 = arith.constant 0 : i32
    return %c0_i32, %c0_i32_0 : i32, i32
  }
  func.func @transform_2(%arg0: i32) -> (i32, i32) {
    %c0_i32 = arith.constant 0 : i32
    %c0_i32_0 = arith.constant 0 : i32
    %c0_i32_1 = arith.constant 0 : i32
    return %c0_i32, %c0_i32_0 : i32, i32
  }
  func.func @transform_3(%arg0: i32) -> (i32, i32) {
    %c0_i32 = arith.constant 0 : i32
    %c0_i32_0 = arith.constant 0 : i32
    %c0_i32_1 = arith.constant 0 : i32
    return %c0_i32, %c0_i32_0 : i32, i32
  }
  func.func @transform_4(%arg0: i32) -> (i32, i32) {
    %c0_i32 = arith.constant 0 : i32
    %c0_i32_0 = arith.constant 0 : i32
    %c0_i32_1 = arith.constant 0 : i32
    return %c0_i32, %c0_i32_0 : i32, i32
  }
  func.func @transform_5(%arg0: i32) -> (i32, i32) {
    %c0_i32 = arith.constant 0 : i32
    %c0_i32_0 = arith.constant 0 : i32
    %c0_i32_1 = arith.constant 0 : i32
    return %c0_i32, %c0_i32_0 : i32, i32
  }
  func.func @transform_6(%arg0: i32) -> (i32, i32) {
    %c0_i32 = arith.constant 0 : i32
    %c0_i32_0 = arith.constant 0 : i32
    %c0_i32_1 = arith.constant 0 : i32
    return %c0_i32, %c0_i32_0 : i32, i32
  }
  func.func @transform_7(%arg0: i32) -> (i32, i32) {
    %c0_i32 = arith.constant 0 : i32
    %c0_i32_0 = arith.constant 0 : i32
    return %arg0, %c0_i32 : i32, i32
  }
}

</mosaic_0001>

<bundles_post_ra>
// kernel: prober_forward.1
= control target key start
LH: loop header
LB: loop body
LE: loop exit
PB: predicated region body
PF: predicated region fallthrough
CT: control target
= control target key end

     0   :  { %12 = vsyncpa [#allocation3], 0  ;;  %s854_s0 = inlined_call_operand.vmem [shape: f32[8,256], index: 0, kind: input, shape index: {}]   ;;  %s855_s1 = inlined_call_operand.vmem [shape: f32[256,128], index: 1, kind: input, shape index: {}]   ;;  %s856_s2 = inlined_call_operand.vmem [shape: f32[1,128], index: 2, kind: input, shape index: {}]   ;;  %s857_s3 = inlined_call_operand.vmem [shape: f32[128,64], index: 3, kind: input, shape index: {}]   ;;  %s858_s4 = inlined_call_operand.hbm [shape: f32[1,64], index: 4, kind: input, shape index: {}]   ;;  %s859_s5 = inlined_call_operand.vmem [shape: f32[64,2], index: 5, kind: input, shape index: {}]   ;;  %s860_s6 = inlined_call_operand.hbm [shape: f32[1,2], index: 6, kind: input, shape index: {}]   ;;  %s861_s7 = inlined_call_operand.vmem [shape: f32[8,2], index: 7, kind: output, shape index: {}]  }
   0x1   :  { %13 = vsyncpa [#allocation5], 0  ;;  %s593_s24 = smov [#allocation2]   ;;  %s594_s26 = smov [#allocation4]  }
   0x2   :  { %s28_s25 = sshll.u32 %s593_s24, 4  ;;  %s40_s27 = sshll.u32 %s594_s26, 4  ;;  %s29_s25 = int_to_ptr.vmem [resolvable:$true] %s28_s25  ;;  %s41_s27 = int_to_ptr.vmem [resolvable:$true] %s40_s27 }
   0x3   :  { %s545_s30 = scalar_lea.hbm %s858_s4, 16 }
   0x4   :  { %p546_p0 = scmp.ne.s32.totalorder %s858_s4, %s545_s30  ;;  %p549_p1 = scmp.lt.u32.totalorder %s545_s30, %s858_s4 }
   0x6   :  { %p551_p2 = pnand %p549_p1, %p546_p0 }
   0x8   :  { %554 = shalt.err (!%p551_p2)
}
   0x9   :  { %s555_s12 = scalar_lea.vmem %s29_s25, 16  ;;  %s559_s13 = scalar_lea.vmem %s29_s25, 32 }
   0xa   :  { %p556_p3 = scmp.ne.s32.totalorder %s29_s25, %s555_s12  ;;  %p560_p4 = scmp.lt.s32.totalorder %s29_s25, %s29_s25 }
   0xb   :  { %p561_p5 = scmp.lt.s32.totalorder %s559_s13, %s555_s12 }
   0xd   :  { %p562_p6 = por %p561_p5, %p560_p4 }
   0xf   :  { %p563_p7 = pnand %p562_p6, %p556_p3 }
  0x11   :  { %566 = shalt.err (!%p563_p7)
}
  0x12   :  { %31 = dma.hbm_to_vmem [thread:$0]  %s858_s4, 16, %s29_s25, [#allocation3]  }
  0x13   :  { %s567_s18 = scalar_lea.hbm %s860_s6, 16 }
  0x14   :  { %p568_p8 = scmp.ne.s32.totalorder %s860_s6, %s567_s18  ;;  %p571_p9 = scmp.lt.u32.totalorder %s567_s18, %s860_s6 }
  0x16   :  { %p573_p10 = pnand %p571_p9, %p568_p8 }
  0x18   :  { %576 = shalt.err (!%p573_p10)
}
  0x19   :  { %s577_s23 = scalar_lea.vmem %s41_s27, 16  ;;  %s581_s24 = scalar_lea.vmem %s41_s27, 32 }
  0x1a   :  { %p578_p11 = scmp.ne.s32.totalorder %s41_s27, %s577_s23  ;;  %p582_p12 = scmp.lt.s32.totalorder %s41_s27, %s41_s27 }
  0x1b   :  { %p583_p13 = scmp.lt.s32.totalorder %s581_s24, %s577_s23 }
  0x1d   :  { %p584_p0 = por %p583_p13, %p582_p12 }
  0x1f   :  { %p585_p1 = pnand %p584_p0, %p578_p11 }
  0x21   :  { %588 = shalt.err (!%p585_p1)
}
  0x22   :  { %43 = dma.hbm_to_vmem [thread:$0]  %s860_s6, 16, %s41_s27, [#allocation5]  }
  0x23   :  { %589 = dma.done.wait [#allocation3], 16  }
  0x24   :  { %590 = vsyncadd [#allocation3], 4294967280 }
  0x25   :  { %591 = dma.done.wait [#allocation5], 16  }
  0x26   :  { %592 = vsyncadd [#allocation5], 4294967280  ;;  %v595_v0 = vmov 0.0|0.0   ;;  %v68_v1 = vld [vmem:[%s855_s1 + $0x80] sm:$0xff]  ;;  %v69_v2 = vld [vmem:[%s855_s1 + $0x88] sm:$0xff]  ;;  %vm596_vm0 = vmmov 0  }
  0x27   :  { %504 = vmatprep.subr.bf16.mxu1 %v595_v0  ;;  %v52_v3 = vld [vmem:[%s855_s1] sm:$0xff]  ;;  %v472_v4 = vpack.c.bf16 %v69_v2, %v68_v1  ;;  %v53_v5 = vld [vmem:[%s855_s1 + $0x8] sm:$0xff]  ;;  %v70_v6 = vld [vmem:[%s855_s1 + $0x90] sm:$0xff]  ;;  %vm271_vm1 = vcmask 523264   ;;  %vm345_vm2 = vcmask 15360  }
  0x28   :  { %v71_v7 = vld [vmem:[%s855_s1 + $0x98] sm:$0xff]  ;;  %v474_v8 = vpack.c.bf16 %v53_v5, %v52_v3  ;;  %v54_v10 = vld [vmem:[%s855_s1 + $0x10] sm:$0xff]  ;;  %v72_v12 = vld [vmem:[%s855_s1 + $0xa0] sm:$0xff] }
  0x29   :  { %v476_v9 = vpack.c.bf16 %v71_v7, %v70_v6  ;;  %v55_v11 = vld [vmem:[%s855_s1 + $0x18] sm:$0xff]  ;;  %473 = vmatprep.subr.bf16.mxu0 %v472_v4  ;;  %v73_v13 = vld [vmem:[%s855_s1 + $0xa8] sm:$0xff]  ;;  %v56_v16 = vld [vmem:[%s855_s1 + $0x20] sm:$0xff] }
  0x2a   :  { %475 = vmatpush3.bf16.msra.mxu0 %v474_v8  ;;  %v478_v14 = vpack.c.bf16 %v55_v11, %v54_v10  ;;  %v480_v15 = vpack.c.bf16 %v73_v13, %v72_v12  ;;  %v57_v17 = vld [vmem:[%s855_s1 + $0x28] sm:$0xff]  ;;  %v74_v18 = vld [vmem:[%s855_s1 + $0xb0] sm:$0xff]  ;;  %v75_v19 = vld [vmem:[%s855_s1 + $0xb8] sm:$0xff]  ;;  %v597_v12 = vmov 0.0  }
  0x2b   :  { %477 = vmatprep.subr.bf16.mxu0 %v476_v9  ;;  %v482_v20 = vpack.c.bf16 %v57_v17, %v56_v16  ;;  %v484_v21 = vpack.c.bf16 %v75_v19, %v74_v18  ;;  %v58_v22 = vld [vmem:[%s855_s1 + $0x30] sm:$0xff]  ;;  %v59_v23 = vld [vmem:[%s855_s1 + $0x38] sm:$0xff]  ;;  %v76_v24 = vld [vmem:[%s855_s1 + $0xc0] sm:$0xff]  ;;  %450 = vmatprep.mubr.msk.f32.mxu1 %vm596_vm0, %v597_v12 }
  0x2c   :  { %v77_v25 = vld [vmem:[%s855_s1 + $0xc8] sm:$0xff]  ;;  %v162_v27 = vld [vmem:[%s857_s3] sm:$0xff]  ;;  %v486_v29 = vpack.c.bf16 %v59_v23, %v58_v22  ;;  %v164_v31 = vld [vmem:[%s857_s3 + $0x10] sm:$0xff] }
  0x2d   :  { %v51_v26 = vld [vmem:[%s854_s0 + $0x8] sm:$0xff]  ;;  %v165_v32 = vld [vmem:[%s857_s3 + $0x18] sm:$0xff]  ;;  %v488_v33 = vpack.c.bf16 %v77_v25, %v76_v24  ;;  %v60_v34 = vld [vmem:[%s855_s1 + $0x40] sm:$0xff] }
  0x2e   :  { %479 = vmatpush3.bf16.msra.mxu0 %v478_v14  ;;  %155 = vmatprep.mubr.f32.mxu0 %v51_v26  ;;  %v163_v28 = vld [vmem:[%s857_s3 + $0x8] sm:$0xff]  ;;  %v78_v36 = vld [vmem:[%s855_s1 + $0xd0] sm:$0xff]  ;;  %v79_v37 = vld [vmem:[%s855_s1 + $0xd8] sm:$0xff]  ;;  %v508_v38 = vpack.c.bf16 %v165_v32, %v164_v31 }
  0x2f   :  { %481 = vmatprep.subr.bf16.mxu0 %v480_v15  ;;  %v505_v30 = vpack.c.bf16 %v163_v28, %v162_v27  ;;  %v61_v35 = vld [vmem:[%s855_s1 + $0x48] sm:$0xff]  ;;  %v166_v39 = vld [vmem:[%s857_s3 + $0x20] sm:$0xff]  ;;  %v492_v42 = vpack.c.bf16 %v79_v37, %v78_v36  ;;  %v62_v43 = vld [vmem:[%s855_s1 + $0x50] sm:$0xff] }
  0x30   :  { %v167_v40 = vld [vmem:[%s857_s3 + $0x28] sm:$0xff]  ;;  %v490_v41 = vpack.c.bf16 %v61_v35, %v60_v34  ;;  %v63_v44 = vld [vmem:[%s855_s1 + $0x58] sm:$0xff]  ;;  %v80_v45 = vld [vmem:[%s855_s1 + $0xe0] sm:$0xff] }
  0x31   :  { %506 = vmatpush3.bf16.msra.mxu1 %v505_v30  ;;  %v81_v46 = vld [vmem:[%s855_s1 + $0xe8] sm:$0xff]  ;;  %v511_v47 = vpack.c.bf16 %v167_v40, %v166_v39  ;;  %v168_v48 = vld [vmem:[%s857_s3 + $0x30] sm:$0xff]  ;;  %v169_v49 = vld [vmem:[%s857_s3 + $0x38] sm:$0xff]  ;;  %v494_v50 = vpack.c.bf16 %v63_v44, %v62_v43 }
  0x32   :  { %483 = vmatpush3.bf16.msra.mxu0 %v482_v20  ;;  %507 = vmatprep.subr.bf16.mxu1 %v595_v0  ;;  %v496_v51 = vpack.c.bf16 %v81_v46, %v80_v45  ;;  %v64_v52 = vld [vmem:[%s855_s1 + $0x60] sm:$0xff]  ;;  %v65_v53 = vld [vmem:[%s855_s1 + $0x68] sm:$0xff]  ;;  %v82_v54 = vld [vmem:[%s855_s1 + $0xf0] sm:$0xff]  ;;  %v514_v56 = vpack.c.bf16 %v169_v49, %v168_v48 }
  0x33   :  { %485 = vmatprep.subr.bf16.mxu0 %v484_v21  ;;  %v83_v55 = vld [vmem:[%s855_s1 + $0xf8] sm:$0xff]  ;;  %v170_v57 = vld [vmem:[%s857_s3 + $0x40] sm:$0xff]  ;;  %v171_v58 = vld [vmem:[%s857_s3 + $0x48] sm:$0xff]  ;;  %v498_v59 = vpack.c.bf16 %v65_v53, %v64_v52 }
  0x34   :  { %v500_v60 = vpack.c.bf16 %v83_v55, %v82_v54  ;;  %v66_v61 = vld [vmem:[%s855_s1 + $0x70] sm:$0xff]  ;;  %v67_v62 = vld [vmem:[%s855_s1 + $0x78] sm:$0xff]  ;;  %v517_v63 = vpack.c.bf16 %v171_v58, %v170_v57  ;;  %v50_v5 = vld [vmem:[%s854_s0] sm:$0xff] }
  0x35   :  { %509 = vmatpush3.bf16.msra.mxu1 %v508_v38  ;;  %v172_v1 = vld [vmem:[%s857_s3 + $0x50] sm:$0xff]  ;;  %v173_v2 = vld [vmem:[%s857_s3 + $0x58] sm:$0xff]  ;;  %v502_v3 = vpack.c.bf16 %v67_v62, %v66_v61  ;;  %v174_v6 = vld [vmem:[%s857_s3 + $0x60] sm:$0xff] }
  0x36   :  { %487 = vmatpush3.bf16.msra.mxu0 %v486_v29  ;;  %510 = vmatprep.subr.bf16.mxu1 %v595_v0  ;;  %v520_v4 = vpack.c.bf16 %v173_v2, %v172_v1  ;;  %v175_v7 = vld [vmem:[%s857_s3 + $0x68] sm:$0xff]  ;;  %v176_v9 = vld [vmem:[%s857_s3 + $0x70] sm:$0xff]  ;;  %v177_v10 = vld [vmem:[%s857_s3 + $0x78] sm:$0xff] }
  0x37   :  { %489 = vmatprep.subr.bf16.mxu0 %v488_v33  ;;  %v523_v8 = vpack.c.bf16 %v175_v7, %v174_v6  ;;  %v526_v11 = vpack.c.bf16 %v177_v10, %v176_v9  ;;  %v256_v13 = vld [vmem:[%s859_s5] sm:$0xff]  ;;  %v257_v14 = vld [vmem:[%s859_s5 + $0x8] sm:$0xff]  ;;  %v258_v15 = vld [vmem:[%s859_s5 + $0x10] sm:$0xff] }
  0x38   :  { %v529_v16 = vpack.c.bf16 %v257_v14, %v256_v13  ;;  %v259_v17 = vld [vmem:[%s859_s5 + $0x18] sm:$0xff]  ;;  %v260_v19 = vld [vmem:[%s859_s5 + $0x20] sm:$0xff]  ;;  %v261_v20 = vld [vmem:[%s859_s5 + $0x28] sm:$0xff] }
  0x39   :  { %512 = vmatpush3.bf16.msra.mxu1 %v511_v47  ;;  %v532_v18 = vpack.c.bf16 %v259_v17, %v258_v15  ;;  %v535_v21 = vpack.c.bf16 %v261_v20, %v260_v19  ;;  %v353_v23 = vld [vmem:[%s856_s2] ss:$0 sm:$0xff]  ;;  %v262_v28 = vld [vmem:[%s859_s5 + $0x30] sm:$0xff]  ;;  %v263_v29 = vld [vmem:[%s859_s5 + $0x38] sm:$0xff] }
  0x3a   :  { %491 = vmatpush3.bf16.msra.mxu0 %v490_v41  ;;  %513 = vmatprep.subr.bf16.mxu1 %v595_v0  ;;  %v538_v30 = vpack.c.bf16 %v263_v29, %v262_v28  ;;  %v355_v35 = vld [vmem:[#allocation4] ss:$0 sm:$0xff] }
  0x3b   :  { %493 = vmatprep.subr.bf16.mxu0 %v492_v42 }
  0x3d   :  { %515 = vmatpush3.bf16.msra.mxu1 %v514_v56 }
  0x3e   :  { %495 = vmatpush3.bf16.msra.mxu0 %v494_v50  ;;  %516 = vmatprep.subr.bf16.mxu1 %v595_v0 }
  0x3f   :  { %497 = vmatprep.subr.bf16.mxu0 %v496_v51 }
  0x41   :  { %518 = vmatpush3.bf16.msra.mxu1 %v517_v63 }
  0x42   :  { %499 = vmatpush3.bf16.msra.mxu0 %v498_v59  ;;  %519 = vmatprep.subr.bf16.mxu1 %v595_v0 }
  0x43   :  { %501 = vmatprep.subr.bf16.mxu0 %v500_v60 }
  0x45   :  { %521 = vmatpush3.bf16.msra.mxu1 %v520_v4 }
  0x46   :  { %503 = vmatpush3.bf16.msra.mxu0 %v502_v3  ;;  %522 = vmatprep.subr.bf16.mxu1 %v595_v0 }
  0x47   :  { %528 = vmatprep.subr.bf16.mxu0 %v595_v0 }
  0x49   :  { %156 = vmatmul.mubr.f32.vlgmr.msra.gmra.mrb[0].mxu0 %v50_v5  ;;  %524 = vmatpush3.bf16.msra.mxu1 %v523_v8 }
  0x4a   :  { %525 = vmatprep.subr.bf16.mxu1 %v595_v0  ;;  %469 = vmatprep.mubr.msk.f32.mxu0 %vm596_vm0, %v597_v12 }
  0x4b   :  { %530 = vmatpush3.bf16.msra.mxu0 %v529_v16 }
  0x4c   :  { %531 = vmatprep.subr.bf16.mxu0 %v595_v0 }
  0x4d   :  { %527 = vmatpush3.bf16.msra.mxu1 %v526_v11 }
  0x4f   :  { %533 = vmatpush3.bf16.msra.mxu0 %v532_v18 }
  0x50   :  { %534 = vmatprep.subr.bf16.mxu0 %v595_v0 }
  0x53   :  { %536 = vmatpush3.bf16.msra.mxu0 %v535_v21 }
  0x54   :  { %537 = vmatprep.subr.bf16.mxu0 %v595_v0  ;;  %v354_v0 = vld [vmem:[#allocation2] ss:$0 sm:$0xff] }
  0x57   :  { %539 = vmatpush3.bf16.msra.mxu0 %v538_v30 }
 0x11c   :  { %v389_v22 = vpop.f32.mrb[0].mxu0 }
 0x11d   :  { %v390_v24 = vpop.f32.mrb[1].mxu0 }
 0x11e   :  { %v391_v25 = vadd.f32 %v390_v24, %v389_v22 }
 0x120   :  { %v158_v26 = vadd.f32 %v391_v25, %v353_v23 }
 0x122   :  { %v161_v27 = vmax.f32 %v158_v26, 0.0 }
 0x124   :  { %451 = vmatmul.mubr.f32.vlgmr.msra.gmra.mrb[0].mxu1 %v161_v27 }
 0x1f7   :  { %v251_v31 = vpop.f32.mrb[0].mxu1 }
 0x1f8   :  { %v252_v32 = vadd.f32 %v354_v0, %v251_v31  ;;  %v452_v33 = vpop.f32.mrb[1].mxu1 }
 0x1fa   :  { %v255_v34 = vmax.f32 %v252_v32, 0.0 }
 0x1fc   :  { %470 = vmatmul.mubr.msk.f32.vlgmr.msra.gmra.mrb[2].mxu0 %vm271_vm1, %v255_v34 }
 0x2cf   :  { %v341_v36 = vpop.f32.mrb[2].mxu0 }
 0x2d0   :  { %v342_v37 = vadd.f32 %v355_v35, %v341_v36  ;;  %v471_v38 = vpop.f32.mrb[3].mxu0 }
 0x2d2   :  { %346 = vst.msk [vmem:[%s861_s7] sm:$0xff] %vm345_vm2, %v342_v37 }
 0x2d3   :  { %351 = vsyncpa [#allocation3], 1 }
 0x2d4   :  { %352 = vsyncpa [#allocation5], 1 }

</bundles_post_ra>
